<compile_context>
chip_gen: v7x
topology: tpu7x:2x2x1
jax: 0.10.0
libtpu: 0.0.40
codegen_flags: <defaults>
</compile_context>

<pallas_src>
import jax
import jax.numpy as jnp
from jax.experimental import pallas as pl
from jax.experimental.pallas import tpu as pltpu


# ----------------------------------------------------------------------------
# Kernel
# ----------------------------------------------------------------------------
def _hcp_fnn_kernel(x_ref, w1_ref, b1_ref, w2_ref, b2_ref, w3_ref, b3_ref,
                    w4_ref, b4_ref, o_ref):
    # x_ref: (TM, In_p) bf16; w*_ref: (K_p, N_p) bf16 (BN folded in);
    # b*_ref: (1, N_p) f32; o_ref: (TM, Out_p) f32.
    def hidden_layer(h_bf16, w_ref, b_ref):
        z = jnp.dot(h_bf16, w_ref[...], preferred_element_type=jnp.float32)
        return jax.nn.sigmoid(z + b_ref[...])          # f32 bias + sigmoid

    h = hidden_layer(x_ref[...], w1_ref, b1_ref)
    h = hidden_layer(h.astype(jnp.bfloat16), w2_ref, b2_ref)
    h = hidden_layer(h.astype(jnp.bfloat16), w3_ref, b3_ref)
    out = jnp.dot(h.astype(jnp.bfloat16), w4_ref[...],
                  preferred_element_type=jnp.float32) + b4_ref[...]
    o_ref[...] = out.astype(o_ref.dtype)


# ----------------------------------------------------------------------------
# Wrapper
# ----------------------------------------------------------------------------
def _round_up(v, m):
    return (v + m - 1) // m * m


def hcp_fnn_pallas(x, layers, final, eps=1e-5):
    """Inference-mode forward of HCP_FNN.

    x:      (B, input_size) float array
    layers: 3 tuples (W, b, gamma, beta, running_mean, running_var) with W in
            PyTorch Linear layout (out_features, in_features)
    final:  (W4, b4) with W4 of shape (1, n_l3)
    Returns (B, 1) float32.
    """
    B, in_size = x.shape

    # ---- fold Linear + (previous layer's BN) into padded bf16 W^T and f32 bias ----
    in_p = _round_up(in_size, 16)                 # K pad only to sublane pack (bf16)
    Ws, Bs = [], []
    k_pad, prev_f = in_p, in_size
    prev_scale = prev_shift = None                # eval-mode BN of the previous layer
    for (W, b, gamma, beta, mean, var) in layers:
        out_f, in_f = W.shape
        assert in_f == prev_f
        out_p = _round_up(out_f, 128)             # lane-dense hidden dims
        Wt = jnp.transpose(W).astype(jnp.float32)             # (in_f, out_f)
        bias = b.astype(jnp.float32)
        if prev_scale is not None:
            bias = bias + prev_shift @ Wt                      # fold BN shift
            Wt = Wt * prev_scale[:, None]                      # fold BN scale (K rows)
        Wt_p = jnp.zeros((k_pad, out_p), jnp.float32).at[:in_f, :out_f].set(Wt)
        b_p = jnp.zeros((1, out_p), jnp.float32).at[0, :out_f].set(bias)
        Ws.append(Wt_p.astype(jnp.bfloat16))
        Bs.append(b_p)
        scale = gamma.astype(jnp.float32) / jnp.sqrt(var.astype(jnp.float32) + eps)
        shift = beta.astype(jnp.float32) - mean.astype(jnp.float32) * scale
        prev_scale, prev_shift = scale, shift
        k_pad, prev_f = out_p, out_f

    W4, b4 = final
    out_f4, in_f4 = W4.shape
    assert in_f4 == prev_f
    out4_p = _round_up(out_f4, 8)                 # narrow (8-lane) output, not 128
    W4t = jnp.transpose(W4).astype(jnp.float32)
    bias4 = b4.astype(jnp.float32) + prev_shift @ W4t          # fold BN3 into fc4
    W4t = W4t * prev_scale[:, None]
    W4p = (jnp.zeros((k_pad, out4_p), jnp.float32)
              .at[:in_f4, :out_f4].set(W4t)).astype(jnp.bfloat16)
    b4p = jnp.zeros((1, out4_p), jnp.float32).at[0, :out_f4].set(bias4)

    # ---- batch tiling: single "parallel" grid axis over row tiles ----
    if B >= 2048:
        TM = 1024                                  # big tiles amortize per-step cost
    elif B > 16:
        TM = _round_up(pl.cdiv(B, 2), 16)          # >=2 steps so v7x uses both TCs
    else:
        TM = 16
    # Cap TM so the double-buffered bf16 x tile stays <= ~4 MiB per buffer.
    cap = max(16, ((4 * 2 ** 20) // (in_p * 2)) // 16 * 16)
    TM = max(16, min(TM, cap, 1024))
    B_pad = _round_up(B, TM)

    xp = (jnp.zeros((B_pad, in_p), jnp.float32)
             .at[:B, :in_size].set(x.astype(jnp.float32))).astype(jnp.bfloat16)

    h1_p, h2_p, h3_p = (int(w.shape[1]) for w in Ws)
    grid = (B_pad // TM,)

    # ---- cost estimate & explicit VMEM budget ----
    flops = 2 * B_pad * (in_p * h1_p + h1_p * h2_p + h2_p * h3_p + h3_p * out4_p)
    bytes_accessed = (2 * xp.size                                     # bf16 x
                      + 2 * (sum(int(w.size) for w in Ws) + int(W4p.size))
                      + 4 * (sum(int(b.size) for b in Bs) + int(b4p.size))
                      + 4 * B_pad * out4_p)                           # f32 out
    cost = pl.CostEstimate(flops=int(flops),
                           transcendentals=int(B_pad * (h1_p + h2_p + h3_p)),
                           bytes_accessed=int(bytes_accessed))

    vmem_need = (2 * (TM * in_p * 2 + TM * out4_p * 4)                # dbl-buf x/out
                 + 2 * (sum(int(w.size) for w in Ws) + int(W4p.size)) * 2
                 + 2 * (sum(int(b.size) for b in Bs) + int(b4p.size)) * 4
                 + TM * (h1_p + h2_p + h3_p) * 4)                     # f32 activations
    vmem_limit = int(min(64 * 2 ** 20, max(32 * 2 ** 20, vmem_need + 8 * 2 ** 20)))

    def _full(i):
        return (0, 0)

    out_pad = pl.pallas_call(
        _hcp_fnn_kernel,
        out_shape=jax.ShapeDtypeStruct((B_pad, out4_p), jnp.float32),
        grid_spec=pltpu.PrefetchScalarGridSpec(
            num_scalar_prefetch=0,
            grid=grid,
            in_specs=[
                pl.BlockSpec((TM, in_p), lambda i: (i, 0)),
                pl.BlockSpec(tuple(Ws[0].shape), _full),
                pl.BlockSpec(tuple(Bs[0].shape), _full),
                pl.BlockSpec(tuple(Ws[1].shape), _full),
                pl.BlockSpec(tuple(Bs[1].shape), _full),
                pl.BlockSpec(tuple(Ws[2].shape), _full),
                pl.BlockSpec(tuple(Bs[2].shape), _full),
                pl.BlockSpec(tuple(W4p.shape), _full),
                pl.BlockSpec(tuple(b4p.shape), _full),
            ],
            out_specs=pl.BlockSpec((TM, out4_p), lambda i: (i, 0)),
        ),
        compiler_params=pltpu.CompilerParams(
            dimension_semantics=("parallel",),
            vmem_limit_bytes=vmem_limit),
        cost_estimate=cost,
    )(xp, Ws[0], Bs[0], Ws[1], Bs[1], Ws[2], Bs[2], W4p, b4p)

    return out_pad[:B, :out_f4]


# ----------------------------------------------------------------------------
# Pure-JAX f32 reference matching the PyTorch eval-mode forward exactly
# ----------------------------------------------------------------------------
def hcp_fnn_ref(x, layers, final, eps=1e-5):
    h = x.astype(jnp.float32)
    for (W, b, gamma, beta, mean, var) in layers:
        h = jax.nn.sigmoid(h @ jnp.transpose(W) + b)                 # Linear + Sigmoid
        h = (h - mean) / jnp.sqrt(var + eps) * gamma + beta          # BatchNorm1d (eval)
    W4, b4 = final
    return h @ jnp.transpose(W4) + b4                                # final Linear


# ----------------------------------------------------------------------------
# Demo / self-test
# ----------------------------------------------------------------------------
def _make_linear(key, in_f, out_f):
    kw, kb = jax.random.split(key)
    limit = (6.0 / (in_f + out_f)) ** 0.5                 # xavier_uniform_
    W = jax.random.uniform(kw, (out_f, in_f), jnp.float32, -limit, limit)
    bb = 1.0 / (in_f ** 0.5)                              # PyTorch Linear bias init
    b = jax.random.uniform(kb, (out_f,), jnp.float32, -bb, bb)
    return W, b


def _make_bn(key, f):
    kg, kb, km, kv = jax.random.split(key, 4)
    gamma = jax.random.uniform(kg, (f,), jnp.float32, 0.5, 1.5)
    beta = 0.1 * jax.random.normal(kb, (f,), jnp.float32)
    mean = 0.1 * jax.random.normal(km, (f,), jnp.float32)
    var = jax.random.uniform(kv, (f,), jnp.float32, 0.5, 1.5)
    return gamma, beta, mean, var


if __name__ == "__main__":
    B, input_size, n_l1, n_l2, n_l3 = 32, 64, 128, 64, 32

    key = jax.random.PRNGKey(0)
    kx, k1, k2, k3, k4, kb1, kb2, kb3 = jax.random.split(key, 8)

    x = jax.random.normal(kx, (B, input_size), jnp.float32)

    W1, b1 = _make_linear(k1, input_size, n_l1)
    W2, b2 = _make_linear(k2, n_l1, n_l2)
    W3, b3 = _make_linear(k3, n_l2, n_l3)
    W4, b4 = _make_linear(k4, n_l3, 1)
    bn1 = _make_bn(kb1, n_l1)
    bn2 = _make_bn(kb2, n_l2)
    bn3 = _make_bn(kb3, n_l3)

    layers = [(W1, b1) + bn1, (W2, b2) + bn2, (W3, b3) + bn3]
    final = (W4, b4)

    out = jax.block_until_ready(hcp_fnn_pallas(x, layers, final))
    ref = jax.block_until_ready(hcp_fnn_ref(x, layers, final))

    assert out.shape == (B, 1), out.shape
    max_err = float(jnp.max(jnp.abs(out - ref)))
    # bf16 inputs/weights (f32 accumulation) -> looser tolerance than pure f32
    assert max_err < 5e-2, f"max abs err {max_err}"

    print("KERNEL_OK")
</pallas_src>

<mosaic_0001>
module attributes {stable_mosaic.version = 11 : i64} {
  func.func @_hcp_fnn_kernel(%arg0: i32, %arg1: memref<16x64xbf16, #tpu.memory_space<vmem>>, %arg2: memref<64x128xbf16, #tpu.memory_space<vmem>>, %arg3: memref<1x128xf32, #tpu.memory_space<vmem>>, %arg4: memref<128x128xbf16, #tpu.memory_space<vmem>>, %arg5: memref<1x128xf32, #tpu.memory_space<vmem>>, %arg6: memref<128x128xbf16, #tpu.memory_space<vmem>>, %arg7: memref<1x128xf32, #tpu.memory_space<vmem>>, %arg8: memref<128x8xbf16, #tpu.memory_space<vmem>>, %arg9: memref<1x8xf32, #tpu.memory_space<vmem>>, %arg10: memref<16x8xf32, #tpu.memory_space<vmem>>) attributes {dimension_semantics = [#tpu.dimension_semantics<parallel>], iteration_bounds = array<i64: 2>, scalar_prefetch = 0 : i64, scratch_operands = 0 : i64, tpu.core_type = #tpu.core_type<tc>, window_params = [{transform_indices = @transform_0, window_bounds = array<i64: 16, 64>}, {pipeline_mode = #tpu.pipeline_mode<synchronous>, transform_indices = @transform_1, window_bounds = array<i64: 64, 128>}, {pipeline_mode = #tpu.pipeline_mode<synchronous>, transform_indices = @transform_2, window_bounds = array<i64: 1, 128>}, {pipeline_mode = #tpu.pipeline_mode<synchronous>, transform_indices = @transform_3, window_bounds = array<i64: 128, 128>}, {pipeline_mode = #tpu.pipeline_mode<synchronous>, transform_indices = @transform_4, window_bounds = array<i64: 1, 128>}, {pipeline_mode = #tpu.pipeline_mode<synchronous>, transform_indices = @transform_5, window_bounds = array<i64: 128, 128>}, {pipeline_mode = #tpu.pipeline_mode<synchronous>, transform_indices = @transform_6, window_bounds = array<i64: 1, 128>}, {pipeline_mode = #tpu.pipeline_mode<synchronous>, transform_indices = @transform_7, window_bounds = array<i64: 128, 8>}, {pipeline_mode = #tpu.pipeline_mode<synchronous>, transform_indices = @transform_8, window_bounds = array<i64: 1, 8>}, {transform_indices = @transform_9, window_bounds = array<i64: 16, 8>}]} {
    %c0 = arith.constant 0 : index
    %c0_0 = arith.constant 0 : index
    %0 = vector.load %arg1[%c0, %c0_0] : memref<16x64xbf16, #tpu.memory_space<vmem>>, vector<16x64xbf16>
    %c0_1 = arith.constant 0 : index
    %c0_2 = arith.constant 0 : index
    %1 = vector.load %arg2[%c0_1, %c0_2] : memref<64x128xbf16, #tpu.memory_space<vmem>>, vector<64x128xbf16>
    %cst = arith.constant dense<0.000000e+00> : vector<16x128xf32>
    %2 = tpu.matmul %0, %1, %cst {dimension_numbers = #tpu.dot_dimension_numbers<[1], [0], [0], [1], [0, 0, 1, 1], [], []>} : vector<16x64xbf16>, vector<64x128xbf16>, vector<16x128xf32> -> vector<16x128xf32>
    %c0_3 = arith.constant 0 : index
    %c0_4 = arith.constant 0 : index
    %3 = vector.load %arg3[%c0_3, %c0_4] : memref<1x128xf32, #tpu.memory_space<vmem>>, vector<1x128xf32>
    %4 = vector.broadcast %3 : vector<1x128xf32> to vector<16x128xf32>
    %5 = arith.addf %2, %4 : vector<16x128xf32>
    %6 = arith.negf %5 : vector<16x128xf32>
    %7 = math.exp %6 : vector<16x128xf32>
    %cst_5 = arith.constant 1.000000e+00 : f32
    %8 = vector.broadcast %cst_5 : f32 to vector<16x128xf32>
    %9 = arith.addf %8, %7 : vector<16x128xf32>
    %10 = arith.divf %8, %9 : vector<16x128xf32>
    %11 = arith.truncf %10 : vector<16x128xf32> to vector<16x128xbf16>
    %c0_6 = arith.constant 0 : index
    %c0_7 = arith.constant 0 : index
    %12 = vector.load %arg4[%c0_6, %c0_7] : memref<128x128xbf16, #tpu.memory_space<vmem>>, vector<128x128xbf16>
    %cst_8 = arith.constant dense<0.000000e+00> : vector<16x128xf32>
    %13 = tpu.matmul %11, %12, %cst_8 {dimension_numbers = #tpu.dot_dimension_numbers<[1], [0], [0], [1], [0, 0, 1, 1], [], []>} : vector<16x128xbf16>, vector<128x128xbf16>, vector<16x128xf32> -> vector<16x128xf32>
    %c0_9 = arith.constant 0 : index
    %c0_10 = arith.constant 0 : index
    %14 = vector.load %arg5[%c0_9, %c0_10] : memref<1x128xf32, #tpu.memory_space<vmem>>, vector<1x128xf32>
    %15 = vector.broadcast %14 : vector<1x128xf32> to vector<16x128xf32>
    %16 = arith.addf %13, %15 : vector<16x128xf32>
    %17 = arith.negf %16 : vector<16x128xf32>
    %18 = math.exp %17 : vector<16x128xf32>
    %cst_11 = arith.constant 1.000000e+00 : f32
    %19 = vector.broadcast %cst_11 : f32 to vector<16x128xf32>
    %20 = arith.addf %19, %18 : vector<16x128xf32>
    %21 = arith.divf %19, %20 : vector<16x128xf32>
    %22 = arith.truncf %21 : vector<16x128xf32> to vector<16x128xbf16>
    %c0_12 = arith.constant 0 : index
    %c0_13 = arith.constant 0 : index
    %23 = vector.load %arg6[%c0_12, %c0_13] : memref<128x128xbf16, #tpu.memory_space<vmem>>, vector<128x128xbf16>
    %cst_14 = arith.constant dense<0.000000e+00> : vector<16x128xf32>
    %24 = tpu.matmul %22, %23, %cst_14 {dimension_numbers = #tpu.dot_dimension_numbers<[1], [0], [0], [1], [0, 0, 1, 1], [], []>} : vector<16x128xbf16>, vector<128x128xbf16>, vector<16x128xf32> -> vector<16x128xf32>
    %c0_15 = arith.constant 0 : index
    %c0_16 = arith.constant 0 : index
    %25 = vector.load %arg7[%c0_15, %c0_16] : memref<1x128xf32, #tpu.memory_space<vmem>>, vector<1x128xf32>
    %26 = vector.broadcast %25 : vector<1x128xf32> to vector<16x128xf32>
    %27 = arith.addf %24, %26 : vector<16x128xf32>
    %28 = arith.negf %27 : vector<16x128xf32>
    %29 = math.exp %28 : vector<16x128xf32>
    %cst_17 = arith.constant 1.000000e+00 : f32
    %30 = vector.broadcast %cst_17 : f32 to vector<16x128xf32>
    %31 = arith.addf %30, %29 : vector<16x128xf32>
    %32 = arith.divf %30, %31 : vector<16x128xf32>
    %33 = arith.truncf %32 : vector<16x128xf32> to vector<16x128xbf16>
    %c0_18 = arith.constant 0 : index
    %c0_19 = arith.constant 0 : index
    %34 = vector.load %arg8[%c0_18, %c0_19] : memref<128x8xbf16, #tpu.memory_space<vmem>>, vector<128x8xbf16>
    %cst_20 = arith.constant dense<0.000000e+00> : vector<16x8xf32>
    %35 = tpu.matmul %33, %34, %cst_20 {dimension_numbers = #tpu.dot_dimension_numbers<[1], [0], [0], [1], [0, 0, 1, 1], [], []>} : vector<16x128xbf16>, vector<128x8xbf16>, vector<16x8xf32> -> vector<16x8xf32>
    %c0_21 = arith.constant 0 : index
    %c0_22 = arith.constant 0 : index
    %36 = vector.load %arg9[%c0_21, %c0_22] : memref<1x8xf32, #tpu.memory_space<vmem>>, vector<1x8xf32>
    %37 = vector.broadcast %36 : vector<1x8xf32> to vector<16x8xf32>
    %38 = arith.addf %35, %37 : vector<16x8xf32>
    %c0_23 = arith.constant 0 : index
    %c0_24 = arith.constant 0 : index
    %39 = vector.load %arg10[%c0_23, %c0_24] : memref<16x8xf32, #tpu.memory_space<vmem>>, vector<16x8xf32>
    tpu.vector_store %arg10[%c0_23, %c0_24], %38 {strides = array<i32>} : memref<16x8xf32, #tpu.memory_space<vmem>>, vector<16x8xf32>,
    return
  }
  func.func @transform_0(%arg0: i32) -> (i32, i32) {
    %c0_i32 = arith.constant 0 : i32
    %c0_i32_0 = arith.constant 0 : i32
    return %arg0, %c0_i32 : i32, i32
  }
  func.func @transform_1(%arg0: i32) -> (i32, i32) {
    %c0_i32 = arith.constant 0 : i32
    %c0_i32_0 = arith.constant 0 : i32
    %c0_i32_1 = arith.constant 0 : i32
    return %c0_i32, %c0_i32_0 : i32, i32
  }
  func.func @transform_2(%arg0: i32) -> (i32, i32) {
    %c0_i32 = arith.constant 0 : i32
    %c0_i32_0 = arith.constant 0 : i32
    %c0_i32_1 = arith.constant 0 : i32
    return %c0_i32, %c0_i32_0 : i32, i32
  }
  func.func @transform_3(%arg0: i32) -> (i32, i32) {
    %c0_i32 = arith.constant 0 : i32
    %c0_i32_0 = arith.constant 0 : i32
    %c0_i32_1 = arith.constant 0 : i32
    return %c0_i32, %c0_i32_0 : i32, i32
  }
  func.func @transform_4(%arg0: i32) -> (i32, i32) {
    %c0_i32 = arith.constant 0 : i32
    %c0_i32_0 = arith.constant 0 : i32
    %c0_i32_1 = arith.constant 0 : i32
    return %c0_i32, %c0_i32_0 : i32, i32
  }
  func.func @transform_5(%arg0: i32) -> (i32, i32) {
    %c0_i32 = arith.constant 0 : i32
    %c0_i32_0 = arith.constant 0 : i32
    %c0_i32_1 = arith.constant 0 : i32
    return %c0_i32, %c0_i32_0 : i32, i32
  }
  func.func @transform_6(%arg0: i32) -> (i32, i32) {
    %c0_i32 = arith.constant 0 : i32
    %c0_i32_0 = arith.constant 0 : i32
    %c0_i32_1 = arith.constant 0 : i32
    return %c0_i32, %c0_i32_0 : i32, i32
  }
  func.func @transform_7(%arg0: i32) -> (i32, i32) {
    %c0_i32 = arith.constant 0 : i32
    %c0_i32_0 = arith.constant 0 : i32
    %c0_i32_1 = arith.constant 0 : i32
    return %c0_i32, %c0_i32_0 : i32, i32
  }
  func.func @transform_8(%arg0: i32) -> (i32, i32) {
    %c0_i32 = arith.constant 0 : i32
    %c0_i32_0 = arith.constant 0 : i32
    %c0_i32_1 = arith.constant 0 : i32
    return %c0_i32, %c0_i32_0 : i32, i32
  }
  func.func @transform_9(%arg0: i32) -> (i32, i32) {
    %c0_i32 = arith.constant 0 : i32
    %c0_i32_0 = arith.constant 0 : i32
    return %arg0, %c0_i32 : i32, i32
  }
}

</mosaic_0001>

<bundles_post_ra>
// kernel: tpu_custom_call.1
= control target key start
LH: loop header
LB: loop body
LE: loop exit
PB: predicated region body
PF: predicated region fallthrough
CT: control target
= control target key end

     0   :  { %14 = vsyncpa [#allocation3], 0  ;;  %s1685_s0 = inlined_call_operand.hbm [shape: bf16[32,64], index: 0, kind: input, shape index: {}]   ;;  %s1686_s1 = inlined_call_operand.hbm [shape: bf16[64,128], index: 1, kind: input, shape index: {}]   ;;  %s1687_s2 = inlined_call_operand.vmem [shape: f32[1,128], index: 2, kind: input, shape index: {}]   ;;  %s1688_s3 = inlined_call_operand.vmem [shape: bf16[128,128], index: 3, kind: input, shape index: {}]   ;;  %s1689_s4 = inlined_call_operand.vmem [shape: f32[1,128], index: 4, kind: input, shape index: {}]   ;;  %s1690_s5 = inlined_call_operand.hbm [shape: bf16[128,128], index: 5, kind: input, shape index: {}]   ;;  %s1691_s6 = inlined_call_operand.vmem [shape: f32[1,128], index: 6, kind: input, shape index: {}]   ;;  %s1692_s7 = inlined_call_operand.vmem [shape: bf16[128,8], index: 7, kind: input, shape index: {}]   ;;  %s1693_s8 = inlined_call_operand.vmem [shape: f32[1,8], index: 8, kind: input, shape index: {}]   ;;  %s1694_s9 = inlined_call_operand.vmem [shape: f32[32,8], index: 9, kind: output, shape index: {}]  }
   0x1   :  { %16 = vsyncpa [#allocation3 + $0x1], 0 }
   0x2   :  { %17 = vsyncpa [#allocation5], 0  ;;  %s1402_s30 = smov 0   ;;  %s1404_s10 = smov 0  }
   0x3   :  { %s1406_s11 = smov 0   ;;  %s1408_s12 = smov 0  }
   0x4 LB: > { %s1699_s13 = sadd.s32 4294967295, %s1343_s12   ;;  %p43_p0 = scmp.ne.s32.totalorder %s1335_s10, %s1331_s30  ;;  %s1343_s12 = sphi %s1408_s12, %s1712_s12   ;;  %s1339_s11 = sphi %s1406_s11, %s1711_s11   ;;  %s1335_s10 = sphi %s1404_s10, %s1710_s10   ;;  %s1331_s30 = sphi %s1402_s30, %s1709_s30  }
   0x5   : > { %p1424_p1 = scmp.eq.s32.totalorder %s1699_s13, 0  ;;  %p942_p2 = scmp.ge.s32.totalorder %s1343_s12, 1 }
   0x6   : > { %p248_p3 = scmp.lt.s32.totalorder %s1343_s12, 3  ;;  %s1345_s17 = smov [#allocation4]  }
   0x7   : > { %s1700_s14 = scalar_select %p1424_p1, 1, 0 }
   0x8   : > { %p1432_p4 = por %p1424_p1, %p43_p0  ;;  %p1436_p5 = pnand %p942_p2, %p248_p3 }
   0x9   : > { %s260_s18 = sshll.u32 %s1345_s17, 4  ;;  %s1346_s20 = smov [#allocation6]   ;;  %s261_s18 = int_to_ptr.vmem [resolvable:$true] %s260_s18 }
   0xa   : > { %s1701_s15 = scalar_select %p1432_p4, 1, 0 }
   0xb   : > { %s1702_s16 = scalar_select %p1436_p5, 1, 0 }
   0xc   : > { %p1112_p6 = pneg %p1436_p5  ;;  %s282_s21 = sshll.u32 %s1346_s20, 4  ;;  %s1448_s21 = int_to_ptr.vmem [resolvable:$true] %s282_s21 }
   0xd   : > { %s1219_s24 = scalar_lea.hbm %s1686_s1, 512 }
   0xe   : > { %p1444_p7 = pnand %p1112_p6, %p1424_p1  ;;  %p1220_p8 = scmp.ne.s32.totalorder %s1686_s1, %s1219_s24 }
   0xf   : > { %p1226_p12 = scmp.lt.u32.totalorder %s1219_s24, %s1686_s1 }
  0x10   : > { %p1221_p9 = pneg %p1444_p7 }
  0x12   : > { %p1222_p10 = pnand %p1221_p9, %p1220_p8 }
  0x14   : > { %p1223_p11 = pneg %p1222_p10 }
  0x16   : > { %p1228_p13 = pnand %p1226_p12, %p1223_p11 }
  0x18   : > { %1231 = shalt.err (!%p1228_p13)
}
  0x19   : > { %s1232_s29 = scalar_lea.vmem %s261_s18, 512  ;;  %p1240_p6 = scmp.lt.s32.totalorder %s261_s18, %s261_s18 }
  0x1a   : > { %p1233_p0 = scmp.ne.s32.totalorder %s261_s18, %s1232_s29  ;;  %p1241_p1 = scmp.lt.s32.totalorder %s1232_s29, %s1232_s29 }
  0x1c   : > { %p1235_p2 = pnand %p1233_p0, %p1221_p9  ;;  %p1242_p4 = por %p1241_p1, %p1240_p6 }
  0x1e   : > { %p1236_p3 = pneg %p1235_p2 }
  0x20   : > { %p1243_p5 = pnand %p1242_p4, %p1236_p3 }
  0x22   : > { %1246 = shalt.err (!%p1243_p5)
}
  0x23   : > { %s1347_s30 = smov 64   ;;  %s1348_s17 = smov 4  }
  0x24   : > { %1115 = dma.hbm_to_vmem [thread:$0]  (!%p1444_p7), %s1686_s1, 512, %s261_s18, [#allocation5], %s1347_s30, %s1347_s30, %s1348_s17  }
  0x25   : > { %s1247_s25 = scalar_lea.hbm %s1690_s5, 1024 }
  0x26   : > { %p1248_p1 = scmp.ne.s32.totalorder %s1690_s5, %s1247_s25  ;;  %p1254_p8 = scmp.lt.u32.totalorder %s1247_s25, %s1690_s5 }
  0x28   : > { %p1250_p4 = pnand %p1248_p1, %p1221_p9 }
  0x2a   : > { %p1251_p5 = pneg %p1250_p4 }
  0x2c   : > { %p1256_p10 = pnand %p1254_p8, %p1251_p5 }
  0x2e   : > { %1259 = shalt.err (!%p1256_p10)
}
  0x2f   : > { %s1260_s18 = scalar_lea.vmem %s1448_s21, 1024  ;;  %p1268_p0 = scmp.lt.s32.totalorder %s1448_s21, %s1448_s21 }
  0x30   : > { %p1261_p11 = scmp.ne.s32.totalorder %s1448_s21, %s1260_s18  ;;  %p1269_p2 = scmp.lt.s32.totalorder %s1260_s18, %s1260_s18 }
  0x32   : > { %p1263_p12 = pnand %p1261_p11, %p1221_p9  ;;  %p1270_p3 = por %p1269_p2, %p1268_p0 }
  0x34   : > { %p1264_p13 = pneg %p1263_p12 }
  0x36   : > { %p1271_p6 = pnand %p1270_p3, %p1264_p13 }
  0x38   : > { %1274 = shalt.err (!%p1271_p6)
}
  0x39   : > { %1118 = dma.hbm_to_vmem [thread:$0]  (!%p1444_p7), %s1690_s5, 1024, %s1448_s21, [#allocation5], %s1347_s30, %s1347_s30, %s1348_s17  }
  0x3a   : > { %s1504_s23 = sadd.s32 1, %s1343_s12   ;;  %s30_s19 = sadd.s32 1, %s1339_s11 }
  0x3b   : > { %s27_s24 = ssub.s32 %s1343_s12, %s1504_s23  ;;  %p37_p9 = scmp.ne.s32.totalorder %s1339_s11, %s1335_s10 }
  0x3c   : > { %p28_p1 = scmp.eq.s32.totalorder %s27_s24, 0  ;;  %p38_p4 = scmp.eq.s32.totalorder %s1343_s12, 0 }
  0x3d   : > { %p1125_p5 = scmp.lt.s32.totalorder %s1343_s12, 2  ;;  %s305_s25 = sand.u32 1, %s1339_s11  }
  0x3e   : > { %s1515_s26 = scalar_select %p28_p1, %s1339_s11, %s30_s19  }
  0x3f   : > { %p39_p8 = por %p38_p4, %p37_p9  ;;  %s946_s27 = sshll.u32 %s305_s25, 3 }
  0x40   : > { %s997_s28 = sshll.u32 %s1343_s12, 7  ;;  %s309_s21 = scalar_lea.vmem [#allocation2], %s946_s27 }
  0x41   : > { %s1521_s20 = scalar_lea.hbm %s1685_s0, %s997_s28  ;;  %s316_s22 = sshll.u32 %s309_s21, 4  ;;  %s1527_s22 = int_to_ptr.vmem [resolvable:$true] %s316_s22 }
  0x42   : > { %p1523_p7 = pnand %p1125_p5, %p39_p8  ;;  %s1529_s19 = scalar_lea.sflag [#allocation3], %s305_s25 }
  0x43   : > { %s1275_s13 = scalar_lea.hbm %s1521_s20, 128  ;;  %s1280_s29 = scalar_lea.hbm %s1685_s0, 256 }
  0x44   : > { %p1276_p10 = scmp.ne.s32.totalorder %s1521_s20, %s1275_s13  ;;  %p1277_p11 = pneg %p1523_p7 }
  0x45   : > { %p1281_p0 = scmp.lt.u32.totalorder %s1521_s20, %s1685_s0  ;;  %p1282_p2 = scmp.lt.u32.totalorder %s1280_s29, %s1275_s13 }
  0x46   : > { %p1278_p12 = pnand %p1277_p11, %p1276_p10  ;;  %p1284_p6 = scmp.lt.u32.totalorder %s1275_s13, %s1521_s20 }
  0x47   : > { %p1283_p3 = por %p1282_p2, %p1281_p0 }
  0x48   : > { %p1279_p13 = pneg %p1278_p12 }
  0x49   : > { %p1285_p9 = por %p1284_p6, %p1283_p3 }
  0x4b   : > { %p1286_p1 = pnand %p1285_p9, %p1279_p13 }
  0x4d   : > { %1289 = shalt.err (!%p1286_p1)
}
  0x4e   : > { %s1290_s25 = scalar_lea.vmem %s1527_s22, 128  ;;  %s1349_s27 = smov [#allocation2]  }
  0x4f   : > { %p1291_p4 = scmp.ne.s32.totalorder %s1527_s22, %s1290_s25  ;;  %s1295_s28 = sshll.u32 %s1349_s27, 4  ;;  %s1296_s28 = int_to_ptr.vmem [resolvable:$false] %s1295_s28 }
  0x50   : > { %s1297_s18 = scalar_lea.vmem %s1296_s28, 256  ;;  %p1298_p10 = scmp.lt.s32.totalorder %s1527_s22, %s1296_s28 }
  0x51   : > { %p1293_p5 = pnand %p1291_p4, %p1277_p11  ;;  %p1299_p12 = scmp.lt.s32.totalorder %s1297_s18, %s1290_s25 }
  0x53   : > { %p1294_p8 = pneg %p1293_p5  ;;  %p1300_p0 = por %p1299_p12, %p1298_p10 }
  0x55   : > { %p1301_p2 = pnand %p1300_p0, %p1294_p8 }
  0x57   : > { %1304 = shalt.err (!%p1301_p2)
}
  0x58   : > { %1122 = dma.hbm_to_vmem [thread:$0]  (!%p1523_p7), %s1521_s20, 128, %s1527_s22, %s1529_s19, %s1347_s30, %s1347_s30, %s1348_s17  }
  0x59   : > { %p1705_p11 = scmp.ne.s32.totalorder %s1702_s16, 0 }
  0x5a   : > { %s330_s13 = sand.u32 (!%p1705_p11), 1, %s1335_s10   ;;  %p1706_p13 = scmp.ne.s32.totalorder (!%p1705_p11), %s1701_s15, 0 }
  0x5b   : > { %328 = sbr.rel (%p1705_p11) target bundleno = 1069 (0x42d), region = 56  ;;  %s950_s29 = sshll.u32 (!%p1705_p11), %s330_s13, 3 }
  0x5c   : > { %s331_s21 = scalar_lea.sflag (!%p1705_p11), [#allocation3], %s330_s13  ;;  %s334_s25 = scalar_lea.vmem (!%p1705_p11), [#allocation2], %s950_s29 }
  0x62   : > { %1322 = dma.done.wait (%p1706_p13), %s331_s21, 128  }
  0x63   : > { %1324 = vsyncadd (%p1706_p13), %s331_s21, 4294967168  ;;  %p1707_p3 = scmp.ne.s32.totalorder %s1700_s14, 0 }
  0x65   : > { %1326 = dma.done.wait (%p1707_p3), [#allocation5], 1536  }
  0x66   : > { %1328 = vsyncadd (%p1707_p3), [#allocation5], 4294965760  ;;  %v1350_v0 = vmov 0.0   ;;  %vm1351_vm0 = vmmov 0   ;;  %v1166_v1 = vld [vmem:[#allocation4] sm:$0xff]   ;;  %v1167_v2 = vld [vmem:[#allocation4 + $0x8] sm:$0xff]  }
  0x67   : > { %1030 = vmatprep.subr.bf16.mxu0 %v1350_v0  ;;  %1038 = vmatprep.mubr.msk.bf16.mxu0 %vm1351_vm0, %v1350_v0  ;;  %v1168_v3 = vld [vmem:[#allocation4 + $0x10] sm:$0xff]   ;;  %vm431_vm1 = vcmask 523264   ;;  %v1169_v4 = vld [vmem:[#allocation4 + $0x18] sm:$0xff]   ;;  %v1173_v8 = vld [vmem:[%s1688_s3 + $0x10] sm:$0xff]   ;;  %s1708_s22 = sadd.s32 4294967295, %s1343_s12   ;;  %vm851_vm2 = vcmask 64512  }
  0x68   : > { %1042 = vmatprep.subr.bf16.mxu1 %v1350_v0  ;;  %1058 = vmatprep.mubr.msk.bf16.mxu1 %vm1351_vm0, %v1350_v0  ;;  %v1170_v5 = vld [vmem:[%s334_s25] sm:$0xff]   ;;  %v1174_v9 = vld [vmem:[%s1688_s3 + $0x18] sm:$0xff]   ;;  %v1177_v12 = vld [vmem:[%s1688_s3 + $0x30] sm:$0xff]   ;;  %s953_s24 = sshll.u32 %s1708_s22, 1 }
  0x69   : > { %1031 = vmatpush3.bf16.msra.mxu0 %v1166_v1  ;;  %v1171_v6 = vld [vmem:[%s1688_s3] sm:$0xff]   ;;  %v1172_v7 = vld [vmem:[%s1688_s3 + $0x8] sm:$0xff]   ;;  %v1178_v13 = vld [vmem:[%s1688_s3 + $0x38] sm:$0xff]   ;;  %p379_p7 = scmp.lt.s32.totalorder %s953_s24, 3 }
  0x6a   : > { %1032 = vmatprep.subr.bf16.mxu0 %v1350_v0  ;;  %1043 = vmatpush3.bf16.msra.mxu1 %v1171_v6  ;;  %v1175_v10 = vld [vmem:[%s1688_s3 + $0x20] sm:$0xff]   ;;  %v1176_v11 = vld [vmem:[%s1688_s3 + $0x28] sm:$0xff]   ;;  %v1179_v30 = vld [vmem:[#allocation6] sm:$0xff]  }
  0x6b   : > { %1044 = vmatprep.subr.bf16.mxu1 %v1350_v0  ;;  %v955_v14 = vld [vmem:[%s1687_s2] ss:$0 sm:$0xff]  ;;  %v1180_v31 = vld [vmem:[#allocation6 + $0x8] sm:$0xff]   ;;  %v1182_v33 = vld [vmem:[#allocation6 + $0x18] sm:$0xff]   ;;  %s1714_s24 = smov (!%p379_p7, %s953_s24), 3 }
  0x6c   : > { %v1181_v32 = vld [vmem:[#allocation6 + $0x10] sm:$0xff]   ;;  %v1183_v34 = vld [vmem:[#allocation6 + $0x20] sm:$0xff]   ;;  %v1184_v35 = vld [vmem:[#allocation6 + $0x28] sm:$0xff]   ;;  %s954_s19 = sshll.u32 %s1714_s24, 3 }
  0x6d   : > { %1033 = vmatpush3.bf16.msra.mxu0 %v1167_v2  ;;  %v1185_v36 = vld [vmem:[#allocation6 + $0x30] sm:$0xff]   ;;  %v1186_v37 = vld [vmem:[#allocation6 + $0x38] sm:$0xff]   ;;  %v1189_v56 = vld [vmem:[%s1692_s7 + $0x10] sm:$0xff]   ;;  %s382_s29 = scalar_lea.vmem %s1694_s9, %s954_s19 }
  0x6e   : > { %1034 = vmatprep.subr.bf16.mxu0 %v1350_v0  ;;  %1045 = vmatpush3.bf16.msra.mxu1 %v1172_v7  ;;  %v964_v38 = vld [vmem:[%s1689_s4] ss:$0 sm:$0xff]  ;;  %v1188_v55 = vld [vmem:[%s1692_s7 + $0x8] sm:$0xff]   ;;  %v1190_v57 = vld [vmem:[%s1692_s7 + $0x18] sm:$0xff]  }
  0x6f   : > { %1046 = vmatprep.subr.bf16.mxu1 %v1350_v0  ;;  %v1187_v54 = vld [vmem:[%s1692_s7] sm:$0xff]   ;;  %v1192_v59 = vld [vmem:[%s1692_s7 + $0x28] sm:$0xff]   ;;  %v1193_v60 = vld [vmem:[%s1692_s7 + $0x30] sm:$0xff]  }
  0x70   : > { %v1191_v58 = vld [vmem:[%s1692_s7 + $0x20] sm:$0xff]   ;;  %v1194_v61 = vld [vmem:[%s1692_s7 + $0x38] sm:$0xff]  }
  0x71   : > { %1035 = vmatpush3.bf16.msra.mxu0 %v1168_v3  ;;  %v975_v62 = vld [vmem:[%s1691_s6] ss:$0 sm:$0xff] }
  0x72   : > { %1036 = vmatprep.subr.bf16.mxu0 %v1350_v0  ;;  %1047 = vmatpush3.bf16.msra.mxu1 %v1173_v8 }
  0x73   : > { %1048 = vmatprep.subr.bf16.mxu1 %v1350_v0 }
  0x75   : > { %1037 = vmatpush3.bf16.msra.mxu0 %v1169_v4 }
  0x76   : > { %1062 = vmatprep.subr.bf16.mxu0 %v1350_v0  ;;  %1049 = vmatpush3.bf16.msra.mxu1 %v1174_v9 }
  0x77   : > { %1050 = vmatprep.subr.bf16.mxu1 %v1350_v0 }
  0x78   : > { %1039 = vmatmul.mubr.msk.bf16.vlgmr.msra.gmra.mrb[0].mxu0 %vm431_vm1, %v1170_v5 }
  0x79   : > { %1078 = vmatprep.mubr.msk.bf16.mxu0 %vm1351_vm0, %v1350_v0  ;;  %1063 = vmatpush3.bf16.msra.mxu0 %v1179_v30 }
  0x7a   : > { %1051 = vmatpush3.bf16.msra.mxu1 %v1175_v10  ;;  %1064 = vmatprep.subr.bf16.mxu0 %v1350_v0 }
  0x7b   : > { %1052 = vmatprep.subr.bf16.mxu1 %v1350_v0 }
  0x7d   : > { %1065 = vmatpush3.bf16.msra.mxu0 %v1180_v31 }
  0x7e   : > { %1053 = vmatpush3.bf16.msra.mxu1 %v1176_v11  ;;  %1066 = vmatprep.subr.bf16.mxu0 %v1350_v0 }
  0x7f   : > { %1054 = vmatprep.subr.bf16.mxu1 %v1350_v0 }
  0x81   : > { %1067 = vmatpush3.bf16.msra.mxu0 %v1181_v32 }
  0x82   : > { %1055 = vmatpush3.bf16.msra.mxu1 %v1177_v12  ;;  %1068 = vmatprep.subr.bf16.mxu0 %v1350_v0 }
  0x83   : > { %1056 = vmatprep.subr.bf16.mxu1 %v1350_v0 }
  0x85   : > { %1069 = vmatpush3.bf16.msra.mxu0 %v1182_v33 }
  0x86   : > { %1057 = vmatpush3.bf16.msra.mxu1 %v1178_v13  ;;  %1070 = vmatprep.subr.bf16.mxu0 %v1350_v0 }
  0x87   : > { %1082 = vmatprep.subr.bf16.mxu1 %v1350_v0 }
  0x89   : > { %1071 = vmatpush3.bf16.msra.mxu0 %v1183_v34 }
  0x8a   : > { %1072 = vmatprep.subr.bf16.mxu0 %v1350_v0 }
  0x8d   : > { %1073 = vmatpush3.bf16.msra.mxu0 %v1184_v35 }
  0x8e   : > { %1074 = vmatprep.subr.bf16.mxu0 %v1350_v0 }
  0x91   : > { %1075 = vmatpush3.bf16.msra.mxu0 %v1185_v36 }
  0x92   : > { %1076 = vmatprep.subr.bf16.mxu0 %v1350_v0 }
  0x95   : > { %1077 = vmatpush3.bf16.msra.mxu0 %v1186_v37 }
 0x14b   : > { %v469_v15 = vpop.f32.mrb[0].mxu0 }
 0x14c   : > { %v470_v16 = vadd.f32 %v955_v14, %v469_v15  ;;  %v1040_v17 = vpop.f32.mrb[1].mxu0 }
 0x14d   : > { %v472_v18 = vpop.f32.mrb[2].mxu0 }
 0x14e   : > { %v962_v19 = vmul.f32 -1.442695, %v470_v16  ;;  %v473_v20 = vadd.f32 %v955_v14, %v472_v18  ;;  %v1041_v21 = vpop.f32.mrb[3].mxu0  ;;  %v986_v14 = vld [vmem:[%s1693_s8] ss:$0 sm:$0xff] }
 0x150   : > { %1195 = vpow2.f32 %v962_v19  ;;  %v963_v22 = vmul.f32 -1.442695, %v473_v20 }
 0x152   : > { %1197 = vpow2.f32 %v963_v22 }
 0x15a   : > { %v1196_v23 = vpop.eup %1195 }
 0x15b   : > { %v482_v24 = vadd.f32 1.0, %v1196_v23 }
 0x15c   : > { %v1198_v25 = vpop.eup %1197 }
 0x15d   : > { %v483_v26 = vadd.f32 1.0, %v1198_v25  ;;  %1199 = vrcp.f32 %v482_v24 }
 0x15f   : > { %1201 = vrcp.f32 %v483_v26 }
 0x167   : > { %v1200_v27 = vpop.eup %1199 }
 0x169   : > { %v1202_v28 = vpop.eup %1201 }
 0x16a   : > { %v488_v29 = vpack.c.bf16 %v1202_v28, %v1200_v27 }
 0x16c   : > { %1059 = vmatmul.mubr.bf16.vlgmr.msra.gmra.mrb[0].mxu1 %v488_v29 }
 0x16d   : > { %1098 = vmatprep.mubr.msk.bf16.mxu1 %vm1351_vm0, %v1350_v0  ;;  %1083 = vmatpush3.bf16.msra.mxu1 %v1187_v54 }
 0x16e   : > { %1084 = vmatprep.subr.bf16.mxu1 %v1350_v0 }
 0x171   : > { %1085 = vmatpush3.bf16.msra.mxu1 %v1188_v55 }
 0x172   : > { %1086 = vmatprep.subr.bf16.mxu1 %v1350_v0 }
 0x175   : > { %1087 = vmatpush3.bf16.msra.mxu1 %v1189_v56 }
 0x176   : > { %1088 = vmatprep.subr.bf16.mxu1 %v1350_v0 }
 0x179   : > { %1089 = vmatpush3.bf16.msra.mxu1 %v1190_v57 }
 0x17a   : > { %1090 = vmatprep.subr.bf16.mxu1 %v1350_v0 }
 0x17d   : > { %1091 = vmatpush3.bf16.msra.mxu1 %v1191_v58 }
 0x17e   : > { %1092 = vmatprep.subr.bf16.mxu1 %v1350_v0 }
 0x181   : > { %1093 = vmatpush3.bf16.msra.mxu1 %v1192_v59 }
 0x182   : > { %1094 = vmatprep.subr.bf16.mxu1 %v1350_v0 }
 0x185   : > { %1095 = vmatpush3.bf16.msra.mxu1 %v1193_v60 }
 0x186   : > { %1096 = vmatprep.subr.bf16.mxu1 %v1350_v0 }
 0x189   : > { %1097 = vmatpush3.bf16.msra.mxu1 %v1194_v61 }
 0x23f   : > { %v594_v39 = vpop.f32.mrb[0].mxu1 }
 0x240   : > { %v595_v40 = vadd.f32 %v964_v38, %v594_v39  ;;  %v1060_v41 = vpop.f32.mrb[1].mxu1 }
 0x241   : > { %v597_v42 = vpop.f32.mrb[2].mxu1 }
 0x242   : > { %v973_v43 = vmul.f32 -1.442695, %v595_v40  ;;  %v598_v44 = vadd.f32 %v964_v38, %v597_v42  ;;  %v1061_v45 = vpop.f32.mrb[3].mxu1 }
 0x244   : > { %1203 = vpow2.f32 %v973_v43  ;;  %v974_v46 = vmul.f32 -1.442695, %v598_v44 }
 0x246   : > { %1205 = vpow2.f32 %v974_v46 }
 0x24e   : > { %v1204_v47 = vpop.eup %1203 }
 0x24f   : > { %v607_v48 = vadd.f32 1.0, %v1204_v47 }
 0x250   : > { %v1206_v49 = vpop.eup %1205 }
 0x251   : > { %v608_v50 = vadd.f32 1.0, %v1206_v49  ;;  %1207 = vrcp.f32 %v607_v48 }
 0x253   : > { %1209 = vrcp.f32 %v608_v50 }
 0x25b   : > { %v1208_v51 = vpop.eup %1207 }
 0x25d   : > { %v1210_v52 = vpop.eup %1209 }
 0x25e   : > { %v613_v53 = vpack.c.bf16 %v1210_v52, %v1208_v51 }
 0x260   : > { %1079 = vmatmul.mubr.bf16.vlgmr.msra.gmra.mrb[4].mxu0 %v613_v53 }
 0x333   : > { %v719_v63 = vpop.f32.mrb[4].mxu0 }
 0x334   : > { %v720_v1 = vadd.f32 %v975_v62, %v719_v63  ;;  %v1080_v2 = vpop.f32.mrb[5].mxu0 }
 0x335   : > { %v722_v3 = vpop.f32.mrb[6].mxu0 }
 0x336   : > { %v984_v4 = vmul.f32 -1.442695, %v720_v1  ;;  %v723_v5 = vadd.f32 %v975_v62, %v722_v3  ;;  %v1081_v6 = vpop.f32.mrb[7].mxu0 }
 0x338   : > { %1211 = vpow2.f32 %v984_v4  ;;  %v985_v7 = vmul.f32 -1.442695, %v723_v5 }
 0x33a   : > { %1213 = vpow2.f32 %v985_v7 }
 0x342   : > { %v1212_v8 = vpop.eup %1211 }
 0x343   : > { %v732_v9 = vadd.f32 1.0, %v1212_v8 }
 0x344   : > { %v1214_v10 = vpop.eup %1213 }
 0x345   : > { %v733_v0 = vadd.f32 1.0, %v1214_v10  ;;  %1215 = vrcp.f32 %v732_v9 }
 0x347   : > { %1217 = vrcp.f32 %v733_v0 }
 0x34f   : > { %v1216_v11 = vpop.eup %1215 }
 0x351   : > { %v1218_v12 = vpop.eup %1217 }
 0x352   : > { %v738_v13 = vpack.c.bf16 %v1218_v12, %v1216_v11 }
 0x354   : > { %1099 = vmatmul.mubr.bf16.vlgmr.msra.gmra.mrb[4].mxu1 %v738_v13 }
 0x427   : > { %v844_v15 = vpop.f32.mrb[4].mxu1 }
 0x428   : > { %v845_v16 = vadd.f32 %v986_v14, %v844_v15  ;;  %v1100_v17 = vpop.f32.mrb[5].mxu1 }
 0x429   : > { %v847_v18 = vpop.f32.mrb[6].mxu1 }
 0x42a   : > { %852 = vst.msk [vmem:[%s382_s29] sm:$0xff] %vm851_vm2, %v845_v16  ;;  %v848_v19 = vadd.f32 %v986_v14, %v847_v18  ;;  %v1101_v20 = vpop.f32.mrb[7].mxu1 }
 0x42c   : > { %853 = vst.msk [vmem:[%s382_s29 + $0x8] sm:$0xff] %vm851_vm2, %v848_v19 }
 0x42d PF: > { %p20_p6 = scmp.ge.s32.totalorder %s1504_s23, 4   ;;  %s1709_s30 = smov %s1335_s10 }
 0x42e   : > { %s1710_s10 = smov %s1339_s11  ;;  %s1711_s11 = smov %s1515_s26 }
 0x42f   : > { %s1712_s12 = smov %s1504_s23  ;;  %22 = sbr.rel (!%p20_p6) target bundleno = 4 (0x4), region = 104 }
 0x436   :  { %876 = vsyncpa [#allocation3], 1 }
 0x437   :  { %878 = vsyncpa [#allocation3 + $0x1], 1 }
 0x438   :  { %879 = vsyncpa [#allocation5], 1 }

</bundles_post_ra>
